<compile_context>
chip_gen: v7x
topology: tpu7x:2x2x1
jax: 0.10.0
libtpu: 0.0.40
codegen_flags: <defaults>
</compile_context>

<pallas_src>
import functools

import jax
import jax.numpy as jnp
from jax.experimental import pallas as pl
from jax.experimental.pallas import tpu as pltpu


# ----------------------------------------------------------------------------
# Pallas kernel: fused (im2col-matmul conv + folded BN) -> ReLU -> partial GAP
# sums for all T timesteps, accumulated across the spatial grid axis.
# ----------------------------------------------------------------------------
def _stem_gap_kernel(patch_ref, w_ref, out_ref, *, chunk):
    # patch_ref : (T, PT, Kb)  bf16  im2col patch rows (+ trailing ones lane)
    # w_ref     : (Kb, Cout)   bf16  BN-scale-folded weight; last row = BN shift
    # out_ref   : (1, T, Cout) f32   per-core partial GAP sums (resident over p)
    p = pl.program_id(1)

    @pl.when(p == 0)
    def _init():
        out_ref[...] = jnp.zeros_like(out_ref)

    T, PT, _ = patch_ref.shape
    cout = w_ref.shape[1]
    w = w_ref[...]
    n_chunks = PT // chunk

    # Per-timestep, per-row-chunk MXU matmuls: the post-matmul f32 intermediate
    # is only (chunk, Cout), so it stays (mostly) in vregs instead of bouncing
    # through a large VMEM temp, and the 3-D patch block is never reshaped.
    parts = []
    for t in range(T):                       # static, tiny (sequence_length)
        part = jnp.zeros((1, cout), jnp.float32)
        for ci in range(n_chunks):           # static slice starts -> free
            rows = patch_ref[t, pl.ds(ci * chunk, chunk), :]
            x = jnp.dot(rows, w, preferred_element_type=jnp.float32)  # (chunk, Cout)
            # BN scale/shift already folded into w (shift rides the ones lane);
            # padded rows are all-zero so ReLU kills their contribution.
            part = part + jnp.maximum(x, 0.0).sum(axis=0, keepdims=True)
        parts.append(part)
    out_ref[...] += jnp.concatenate(parts, axis=0)[None]   # (1, T, Cout)


# ----------------------------------------------------------------------------
# Host-side glue
# ----------------------------------------------------------------------------
def _im2col_hwc(img_hwc, k, stride, pad):
    """img_hwc: (H, W, C) -> (P, k*k*C) patches, K ordering = (kh, kw, C)."""
    H, W, C = img_hwc.shape
    xp = jnp.pad(img_hwc, ((pad, pad), (pad, pad), (0, 0)))
    Ho = (H + 2 * pad - k) // stride + 1
    Wo = (W + 2 * pad - k) // stride + 1
    slabs = []
    for i in range(k):
        for j in range(k):
            slabs.append(xp[i:i + stride * Ho:stride, j:j + stride * Wo:stride, :])
    p = jnp.stack(slabs, axis=2)                 # (Ho, Wo, k*k, C)
    return p.reshape(Ho * Wo, k * k * C), Ho, Wo


def _round_up(x, m):
    return ((x + m - 1) // m) * m


def _plan_tiling(P, chunk_target=256, max_rows=3072):
    """Row-tiling plan for the GAP reduction over the P patch rows.

    chunk          : in-kernel M sub-tile (rows per MXU matmul)
    PT             : rows per grid step (multiple of chunk)
    ncores         : leading "parallel" grid axis (2 -> both v7x TensorCores)
    tiles_per_core : reduction steps per core
    P_pad          : padded row count (zero rows contribute nothing post-ReLU)

    At max_rows=3072 the double-buffered bf16 patch block stays a few MiB even
    at 224x224, comfortably inside the default scoped VMEM on v5e/v6e/v7x.
    """
    chunk = min(chunk_target, _round_up(P, 8))
    ncores = 2 if P > chunk else 1
    rows_per_core = pl.cdiv(P, ncores)
    tiles_per_core = max(1, pl.cdiv(rows_per_core, max_rows))
    PT = _round_up(pl.cdiv(rows_per_core, tiles_per_core), chunk)
    P_pad = ncores * tiles_per_core * PT
    return chunk, PT, ncores, tiles_per_core, P_pad


def seqvit_forward(inputs_hwc, params, sequence_length=3):
    """inputs_hwc: (H, W, sequence_length**2) input (matches the PyTorch module
    before its permute/unsqueeze). Returns (1, sequence_length, Cout)."""
    inputs_hwc = inputs_hwc.astype(jnp.float32)    # inputs.float()
    conv_w = params["conv_w"]                      # (Cout, Cin, k, k) PyTorch layout
    Cout, Cin, k, _ = conv_w.shape
    stride, pad = 2, 3
    eps = 1e-5

    # Fold BN (inference) fully into the conv weight: per-channel scale into the
    # weight columns, shift placed on an extra "bias" K row that pairs with a
    # trailing all-ones patch lane.
    scale = params["bn_gamma"] / jnp.sqrt(params["bn_var"] + eps)      # (Cout,)
    shift = params["bn_beta"] - params["bn_mean"] * scale              # (Cout,)

    # Flatten weight to (k*k*Cin, Cout) matching the im2col (kh, kw, C) ordering.
    w_flat = jnp.transpose(conv_w, (2, 3, 1, 0)).reshape(k * k * Cin, Cout)
    w_fold = jnp.concatenate([w_flat * scale[None, :], shift[None, :]],
                             axis=0).astype(jnp.bfloat16)              # (Kb, Cout)
    Kb = k * k * Cin + 1          # 147 conv taps + 1 bias lane = 148 (no pad to 256)

    # Per-timestep channel slices -> im2col patches, fused into one tensor.
    T = sequence_length
    patch_list = []
    for t in range(T):
        img_t = inputs_hwc[:, :, t * T:(t + 1) * T]
        patches_t, _, _ = _im2col_hwc(img_t, k, stride, pad)
        patch_list.append(patches_t)
    patches = jnp.stack(patch_list, axis=0)        # (T, P, K) f32
    P = patches.shape[1]

    chunk, PT, ncores, tiles_per_core, P_pad = _plan_tiling(P)

    # Append the ones lane (carries the folded BN shift through the matmul),
    # then zero-pad rows up to the tile grid; padded rows (ones lane included)
    # are all-zero, so they add nothing after ReLU and the mean uses true P.
    patches = jnp.concatenate([patches, jnp.ones((T, P, 1), jnp.float32)], axis=-1)
    patches = jnp.pad(patches, ((0, 0), (0, P_pad - P), (0, 0)))
    patches = patches.astype(jnp.bfloat16)         # (T, P_pad, Kb)

    kernel = functools.partial(_stem_gap_kernel, chunk=chunk)

    partials = pl.pallas_call(
        kernel,
        out_shape=jax.ShapeDtypeStruct((ncores, T, Cout), jnp.float32),
        grid_spec=pltpu.PrefetchScalarGridSpec(
            num_scalar_prefetch=0,
            grid=(ncores, tiles_per_core),
            in_specs=[
                # Last dim 148 equals the full array dim (legal block shape),
                # so only 148 lanes/row travel over HBM (no pad-to-256 bytes).
                pl.BlockSpec((T, PT, Kb),
                             lambda c, p: (0, c * tiles_per_core + p, 0)),
                pl.BlockSpec((Kb, Cout), lambda c, p: (0, 0)),
            ],
            out_specs=pl.BlockSpec((1, T, Cout), lambda c, p: (c, 0, 0)),
        ),
        compiler_params=pltpu.CompilerParams(
            # axis 0: independent halves of P (sharded across v7x's 2 TCs);
            # axis 1: GAP reduction accumulating into the resident out block.
            dimension_semantics=("parallel", "arbitrary")),
    )(patches, w_fold)

    out = partials.sum(axis=0) * (1.0 / float(P))  # combine core partials; GAP mean
    # torch.stack(outputs, dim=1) with batch=1 -> (1, T, Cout)
    return out.reshape(1, T, Cout)


# ----------------------------------------------------------------------------
# Plain-JAX reference (lax.conv) for a numerical sanity check
# ----------------------------------------------------------------------------
def _reference_forward(inputs_hwc, params, sequence_length):
    x = inputs_hwc.astype(jnp.float32)
    x = jnp.transpose(x, (2, 0, 1))[None]          # (1, C_total, H, W)
    w = params["conv_w"].astype(jnp.float32)
    eps = 1e-5
    scale = params["bn_gamma"] / jnp.sqrt(params["bn_var"] + eps)
    shift = params["bn_beta"] - params["bn_mean"] * scale
    T = sequence_length
    outs = []
    for t in range(T):
        xt = x[:, t * T:(t + 1) * T]
        y = jax.lax.conv_general_dilated(
            xt, w, window_strides=(2, 2), padding=((3, 3), (3, 3)),
            dimension_numbers=("NCHW", "OIHW", "NCHW"))
        y = y * scale[None, :, None, None] + shift[None, :, None, None]
        y = jnp.maximum(y, 0.0)
        outs.append(jnp.mean(y, axis=(2, 3)))      # (1, Cout)
    return jnp.stack(outs, axis=1)                 # (1, T, Cout)


def init_params(key, cout=256, cin=3, k=7):
    kw, kg, kb, km, kv = jax.random.split(key, 5)
    conv_w = 0.05 * jax.random.normal(kw, (cout, cin, k, k), dtype=jnp.float32)
    return {
        "conv_w": conv_w,
        "bn_gamma": 1.0 + 0.1 * jax.random.normal(kg, (cout,), jnp.float32),
        "bn_beta": 0.1 * jax.random.normal(kb, (cout,), jnp.float32),
        "bn_mean": 0.1 * jax.random.normal(km, (cout,), jnp.float32),
        "bn_var": 1.0 + 0.1 * jax.random.uniform(kv, (cout,), jnp.float32),
    }


if __name__ == "__main__":
    key = jax.random.PRNGKey(0)
    sequence_length = 3
    image_size = 16
    c_total = sequence_length * sequence_length    # channel-slice loop needs S*S channels

    kx, kp = jax.random.split(key)
    # Input matches the module's expectation: (H, W, C_total) before permute/unsqueeze.
    x = jax.random.normal(kx, (image_size, image_size, c_total), dtype=jnp.float32)
    params = init_params(kp, cout=256, cin=sequence_length, k=7)

    fwd = jax.jit(functools.partial(seqvit_forward, sequence_length=sequence_length))
    out = jax.block_until_ready(fwd(x, params))

    assert out.shape == (1, sequence_length, 256), out.shape
    assert out.dtype == jnp.float32

    # Numerical sanity check vs plain-JAX conv reference (tolerances sized for
    # bf16 matmul operands with f32 accumulation and the folded BN).
    ref = _reference_forward(x, params, sequence_length)
    max_err = float(jnp.max(jnp.abs(out - ref)))
    assert jnp.allclose(out, ref, atol=5e-2, rtol=5e-2), max_err

    print("KERNEL_OK")
</pallas_src>

<mosaic_0001>
module attributes {stable_mosaic.version = 11 : i64} {
  func.func @_stem_gap_kernel(%arg0: i32, %arg1: i32, %arg2: memref<3x64x148xbf16, #tpu.memory_space<vmem>>, %arg3: memref<148x256xbf16, #tpu.memory_space<vmem>>, %arg4: memref<1x3x256xf32, #tpu.memory_space<vmem>>) attributes {dimension_semantics = [#tpu.dimension_semantics<parallel>, #tpu.dimension_semantics<arbitrary>], iteration_bounds = array<i64: 1, 1>, scalar_prefetch = 0 : i64, scratch_operands = 0 : i64, tpu.core_type = #tpu.core_type<tc>, window_params = [{transform_indices = @transform_0, window_bounds = array<i64: 3, 64, 148>}, {pipeline_mode = #tpu.pipeline_mode<synchronous>, transform_indices = @transform_1, window_bounds = array<i64: 148, 256>}, {transform_indices = @transform_2, window_bounds = array<i64: 1, 3, 256>}]} {
    %c0_i32 = arith.constant 0 : i32
    %0 = arith.cmpi eq, %arg1, %c0_i32 : i32
    %1 = arith.extui %0 : i1 to i32
    %c0_i32_0 = arith.constant 0 : i32
    %2 = arith.cmpi ne, %1, %c0_i32_0 : i32
    scf.if %2 {
      %cst_26 = arith.constant 0.000000e+00 : f32
      %36 = vector.broadcast %cst_26 : f32 to vector<1x3x256xf32>
      %c0_27 = arith.constant 0 : index
      %c0_28 = arith.constant 0 : index
      %c0_29 = arith.constant 0 : index
      %37 = vector.load %arg4[%c0_27, %c0_28, %c0_29] : memref<1x3x256xf32, #tpu.memory_space<vmem>>, vector<1x3x256xf32>
      tpu.vector_store %arg4[%c0_27, %c0_28, %c0_29], %36 {strides = array<i32>} : memref<1x3x256xf32, #tpu.memory_space<vmem>>, vector<1x3x256xf32>,
    } else {
    }
    %c0 = arith.constant 0 : index
    %c0_1 = arith.constant 0 : index
    %3 = vector.load %arg3[%c0, %c0_1] : memref<148x256xbf16, #tpu.memory_space<vmem>>, vector<148x256xbf16>
    %cst = arith.constant 0.000000e+00 : f32
    %4 = vector.broadcast %cst : f32 to vector<1x256xf32>
    %c0_2 = arith.constant 0 : index
    %c0_3 = arith.constant 0 : index
    %c0_4 = arith.constant 0 : index
    %5 = vector.load %arg2[%c0_2, %c0_3, %c0_4] : memref<3x64x148xbf16, #tpu.memory_space<vmem>>, vector<1x64x148xbf16>
    %6 = vector.shape_cast %5 : vector<1x64x148xbf16> to vector<64x148xbf16>
    %cst_5 = arith.constant dense<0.000000e+00> : vector<64x256xf32>
    %7 = tpu.matmul %6, %3, %cst_5 {dimension_numbers = #tpu.dot_dimension_numbers<[1], [0], [0], [1], [0, 0, 1, 1], [], []>} : vector<64x148xbf16>, vector<148x256xbf16>, vector<64x256xf32> -> vector<64x256xf32>
    %cst_6 = arith.constant 0.000000e+00 : f32
    %8 = vector.broadcast %cst_6 : f32 to vector<64x256xf32>
    %9 = arith.maximumf %7, %8 : vector<64x256xf32>
    %cst_7 = arith.constant dense<0.000000e+00> : vector<256xf32>
    %10 = vector.multi_reduction <add>, %9, %cst_7 [0] : vector<64x256xf32> to vector<256xf32>
    %11 = vector.shape_cast %10 : vector<256xf32> to vector<1x256xf32>
    %12 = arith.addf %4, %11 : vector<1x256xf32>
    %cst_8 = arith.constant 0.000000e+00 : f32
    %13 = vector.broadcast %cst_8 : f32 to vector<1x256xf32>
    %c1 = arith.constant 1 : index
    %c0_9 = arith.constant 0 : index
    %c0_10 = arith.constant 0 : index
    %14 = vector.load %arg2[%c1, %c0_9, %c0_10] : memref<3x64x148xbf16, #tpu.memory_space<vmem>>, vector<1x64x148xbf16>
    %15 = vector.shape_cast %14 : vector<1x64x148xbf16> to vector<64x148xbf16>
    %cst_11 = arith.constant dense<0.000000e+00> : vector<64x256xf32>
    %16 = tpu.matmul %15, %3, %cst_11 {dimension_numbers = #tpu.dot_dimension_numbers<[1], [0], [0], [1], [0, 0, 1, 1], [], []>} : vector<64x148xbf16>, vector<148x256xbf16>, vector<64x256xf32> -> vector<64x256xf32>
    %cst_12 = arith.constant 0.000000e+00 : f32
    %17 = vector.broadcast %cst_12 : f32 to vector<64x256xf32>
    %18 = arith.maximumf %16, %17 : vector<64x256xf32>
    %cst_13 = arith.constant dense<0.000000e+00> : vector<256xf32>
    %19 = vector.multi_reduction <add>, %18, %cst_13 [0] : vector<64x256xf32> to vector<256xf32>
    %20 = vector.shape_cast %19 : vector<256xf32> to vector<1x256xf32>
    %21 = arith.addf %13, %20 : vector<1x256xf32>
    %cst_14 = arith.constant 0.000000e+00 : f32
    %22 = vector.broadcast %cst_14 : f32 to vector<1x256xf32>
    %c2 = arith.constant 2 : index
    %c0_15 = arith.constant 0 : index
    %c0_16 = arith.constant 0 : index
    %23 = vector.load %arg2[%c2, %c0_15, %c0_16] : memref<3x64x148xbf16, #tpu.memory_space<vmem>>, vector<1x64x148xbf16>
    %24 = vector.shape_cast %23 : vector<1x64x148xbf16> to vector<64x148xbf16>
    %cst_17 = arith.constant dense<0.000000e+00> : vector<64x256xf32>
    %25 = tpu.matmul %24, %3, %cst_17 {dimension_numbers = #tpu.dot_dimension_numbers<[1], [0], [0], [1], [0, 0, 1, 1], [], []>} : vector<64x148xbf16>, vector<148x256xbf16>, vector<64x256xf32> -> vector<64x256xf32>
    %cst_18 = arith.constant 0.000000e+00 : f32
    %26 = vector.broadcast %cst_18 : f32 to vector<64x256xf32>
    %27 = arith.maximumf %25, %26 : vector<64x256xf32>
    %cst_19 = arith.constant dense<0.000000e+00> : vector<256xf32>
    %28 = vector.multi_reduction <add>, %27, %cst_19 [0] : vector<64x256xf32> to vector<256xf32>
    %29 = vector.shape_cast %28 : vector<256xf32> to vector<1x256xf32>
    %30 = arith.addf %22, %29 : vector<1x256xf32>
    %c0_20 = arith.constant 0 : index
    %c0_21 = arith.constant 0 : index
    %c0_22 = arith.constant 0 : index
    %31 = vector.load %arg4[%c0_20, %c0_21, %c0_22] : memref<1x3x256xf32, #tpu.memory_space<vmem>>, vector<1x3x256xf32>
    %32 = tpu.concatenate %12, %21, %30 in 0 : vector<1x256xf32>, vector<1x256xf32>, vector<1x256xf32> -> vector<3x256xf32>
    %33 = vector.shape_cast %32 : vector<3x256xf32> to vector<1x3x256xf32>
    %34 = arith.addf %31, %33 : vector<1x3x256xf32>
    %c0_23 = arith.constant 0 : index
    %c0_24 = arith.constant 0 : index
    %c0_25 = arith.constant 0 : index
    %35 = vector.load %arg4[%c0_23, %c0_24, %c0_25] : memref<1x3x256xf32, #tpu.memory_space<vmem>>, vector<1x3x256xf32>
    tpu.vector_store %arg4[%c0_23, %c0_24, %c0_25], %34 {strides = array<i32>} : memref<1x3x256xf32, #tpu.memory_space<vmem>>, vector<1x3x256xf32>,
    return
  }
  func.func @transform_0(%arg0: i32, %arg1: i32) -> (i32, i32, i32) {
    %c1_i32 = arith.constant 1 : i32
    %0 = arith.muli %arg0, %c1_i32 : i32
    %1 = arith.addi %0, %arg1 : i32
    %c0_i32 = arith.constant 0 : i32
    %c0_i32_0 = arith.constant 0 : i32
    %c0_i32_1 = arith.constant 0 : i32
    return %c0_i32, %1, %c0_i32_0 : i32, i32, i32
  }
  func.func @transform_1(%arg0: i32, %arg1: i32) -> (i32, i32) {
    %c0_i32 = arith.constant 0 : i32
    %c0_i32_0 = arith.constant 0 : i32
    %c0_i32_1 = arith.constant 0 : i32
    return %c0_i32, %c0_i32_0 : i32, i32
  }
  func.func @transform_2(%arg0: i32, %arg1: i32) -> (i32, i32, i32) {
    %c0_i32 = arith.constant 0 : i32
    %c0_i32_0 = arith.constant 0 : i32
    %c0_i32_1 = arith.constant 0 : i32
    return %arg0, %c0_i32, %c0_i32_0 : i32, i32, i32
  }
}

</mosaic_0001>

<bundles_post_ra>
// kernel: seqvit_forward.1
= control target key start
LH: loop header
LB: loop body
LE: loop exit
PB: predicated region body
PF: predicated region fallthrough
CT: control target
= control target key end

     0   :  { %vm200_vm0 = vcmask 162816   ;;  %vm213_vm1 = vcmask 1041408   ;;  %v868_v46 = vmov 0.0   ;;  %vm686_vm2 = vcmask 1040384   ;;  %s1163_s1 = inlined_call_operand.vmem [shape: bf16[148,256], index: 1, kind: input, shape index: {}]   ;;  %s1164_s0 = inlined_call_operand.vmem [shape: bf16[3,64,148], index: 0, kind: input, shape index: {}]   ;;  %s1165_s2 = inlined_call_operand.vmem [shape: f32[1,3,256], index: 2, kind: output, shape index: {}]  }
   0x1   :  { %v887_v0 = vld [vmem:[%s1163_s1 + $0x4] ss:$8 sps:$4 sm:$0xff]   ;;  %v892_v1 = vld [vmem:[%s1163_s1] ss:$8 sps:$4 sm:$0xff]   ;;  %v899_v2 = vld [vmem:[%s1163_s1 + $0x14] ss:$8 sps:$4 sm:$0xff]  }
   0x2   :  { %220 = vmatprep.subr.bf16.mxu0 %v887_v0  ;;  %394 = vmatprep.subr.bf16.mxu1 %v887_v0  ;;  %v906_v3 = vld [vmem:[%s1163_s1 + $0x10] ss:$8 sps:$4 sm:$0xff]   ;;  %v913_v4 = vld [vmem:[%s1163_s1 + $0x24] ss:$8 sps:$4 sm:$0xff]   ;;  %v920_v5 = vld [vmem:[%s1163_s1 + $0x20] ss:$8 sps:$4 sm:$0xff]  }
   0x3   :  { %221 = vmatpush1.bf16.msra.mxu0 %v892_v1  ;;  %395 = vmatpush1.bf16.msra.mxu1 %v892_v1  ;;  %v927_v6 = vld [vmem:[%s1163_s1 + $0x34] ss:$8 sps:$4 sm:$0xff]   ;;  %v934_v7 = vld [vmem:[%s1163_s1 + $0x30] ss:$8 sps:$4 sm:$0xff]   ;;  %v941_v8 = vld [vmem:[%s1163_s1 + $0x44] ss:$8 sps:$4 sm:$0xff]  }
   0x4   :  { %222 = vmatprep.subr.bf16.mxu0 %v899_v2  ;;  %396 = vmatprep.subr.bf16.mxu1 %v899_v2  ;;  %v834_v9 = vld [vmem:[%s1164_s0 + $0x4] ss:$8 sps:$4 sm:$0xff]   ;;  %v954_v11 = vld [vmem:[%s1163_s1 + $0x40] ss:$8 sps:$4 sm:$0xff]   ;;  %v961_v12 = vld [vmem:[%s1163_s1 + $0x54] ss:$8 sps:$4 sm:$0xff]  }
   0x5   :  { %v837_v10 = vld [vmem:[%s1164_s0 + $0x44] ss:$8 sps:$4 sm:$0xff]   ;;  %736 = vmatprep.mubr.msk.bf16.mxu0 %vm200_vm0, %v834_v9  ;;  %v970_v13 = vld [vmem:[%s1163_s1 + $0x50] ss:$8 sps:$4 sm:$0xff]   ;;  %v984_v15 = vld [vmem:[%s1163_s1 + $0x60] ss:$8 sps:$4 sm:$0xff]  }
   0x6   :  { %757 = vmatprep.mubr.msk.bf16.mxu1 %vm200_vm0, %v837_v10  ;;  %v977_v14 = vld [vmem:[%s1163_s1 + $0x64] ss:$8 sps:$4 sm:$0xff]   ;;  %v991_v16 = vld [vmem:[%s1163_s1 + $0x74] ss:$8 sps:$4 sm:$0xff]   ;;  %v998_v17 = vld [vmem:[%s1163_s1 + $0x70] ss:$8 sps:$4 sm:$0xff]  }
   0x7   :  { %223 = vmatpush1.bf16.msra.mxu0 %v906_v3  ;;  %397 = vmatpush1.bf16.msra.mxu1 %v906_v3  ;;  %v1005_v18 = vld [vmem:[%s1163_s1 + $0x84] ss:$8 sps:$4 sm:$0xff]   ;;  %v60_v19 = vld [vmem:[%s1163_s1 + $0x90] sm:$0x33]  ;;  %v1015_v20 = vld [vmem:[%s1163_s1 + $0x80] ss:$8 sps:$4 sm:$0xff]  }
   0x8   :  { %224 = vmatprep.subr.bf16.mxu0 %v913_v4  ;;  %398 = vmatprep.subr.bf16.mxu1 %v913_v4  ;;  %v1019_v21 = vcombine.high %v60_v19, %v60_v19  ;;  %v733_v22 = vcombine.low %v60_v19, %v60_v19  ;;  %v832_v24 = vld [vmem:[%s1164_s0] ss:$8 sps:$4 sm:$0xff]   ;;  %v838_v26 = vld [vmem:[%s1164_s0 + $0x14] ss:$8 sps:$4 sm:$0xff]   ;;  %v842_v28 = vld [vmem:[%s1164_s0 + $0x10] ss:$8 sps:$4 sm:$0xff]  }
   0x9   :  { %v835_v25 = vld [vmem:[%s1164_s0 + $0x40] ss:$8 sps:$4 sm:$0xff]   ;;  %v840_v27 = vld [vmem:[%s1164_s0 + $0x54] ss:$8 sps:$4 sm:$0xff]   ;;  %v843_v29 = vld [vmem:[%s1164_s0 + $0x50] ss:$8 sps:$4 sm:$0xff]  }
   0xa   :  { %v1028_v23 = vsel %vm213_vm1, %v733_v22, 0  ;;  %v844_v30 = vld [vmem:[%s1164_s0 + $0x24] ss:$8 sps:$4 sm:$0xff]   ;;  %v848_v32 = vld [vmem:[%s1164_s0 + $0x20] ss:$8 sps:$4 sm:$0xff]   ;;  %41 = vst [vmem:[%s1165_s2] sm:$0x77] %v868_v46 }
   0xb   :  { %225 = vmatpush1.bf16.msra.mxu0 %v920_v5  ;;  %399 = vmatpush1.bf16.msra.mxu1 %v920_v5  ;;  %v846_v31 = vld [vmem:[%s1164_s0 + $0x64] ss:$8 sps:$4 sm:$0xff]   ;;  %v849_v33 = vld [vmem:[%s1164_s0 + $0x60] ss:$8 sps:$4 sm:$0xff]   ;;  %v850_v34 = vld [vmem:[%s1164_s0 + $0x34] ss:$8 sps:$4 sm:$0xff]  }
   0xc   :  { %226 = vmatprep.subr.bf16.mxu0 %v927_v6  ;;  %400 = vmatprep.subr.bf16.mxu1 %v927_v6  ;;  %v852_v35 = vld [vmem:[%s1164_s0 + $0x74] ss:$8 sps:$4 sm:$0xff]   ;;  %v854_v36 = vld [vmem:[%s1164_s0 + $0x30] ss:$8 sps:$4 sm:$0xff]   ;;  %v858_v38 = vld [vmem:[%s1164_s0 + $0x84] ss:$8 sps:$4 sm:$0xff]  }
   0xd   :  { %v855_v37 = vld [vmem:[%s1164_s0 + $0x70] ss:$8 sps:$4 sm:$0xff]   ;;  %v861_v39 = vld [vmem:[%s1164_s0 + $0xa4] ss:$8 sps:$4 sm:$0xff]   ;;  %v856_v40 = vld [vmem:[%s1164_s0 + $0x80] ss:$8 sps:$4 sm:$0xff]  }
   0xe   :  { %v859_v41 = vld [vmem:[%s1164_s0 + $0xa0] ss:$8 sps:$4 sm:$0xff]   ;;  %v862_v42 = vld [vmem:[%s1164_s0 + $0x94] ss:$8 sps:$4 sm:$0xff]   ;;  %v864_v44 = vld [vmem:[%s1164_s0 + $0x90] ss:$8 sps:$4 sm:$0xff]  }
   0xf   :  { %227 = vmatpush1.bf16.msra.mxu0 %v934_v7  ;;  %401 = vmatpush1.bf16.msra.mxu1 %v934_v7  ;;  %v865_v43 = vld [vmem:[%s1164_s0 + $0xb4] ss:$8 sps:$4 sm:$0xff]   ;;  %v867_v45 = vld [vmem:[%s1164_s0 + $0xb0] ss:$8 sps:$4 sm:$0xff]  }
  0x10   :  { %228 = vmatprep.subr.bf16.mxu0 %v941_v8  ;;  %402 = vmatprep.subr.bf16.mxu1 %v941_v8 }
  0x13   :  { %229 = vmatpush1.bf16.msra.mxu0 %v954_v11  ;;  %403 = vmatpush1.bf16.msra.mxu1 %v954_v11 }
  0x14   :  { %230 = vmatprep.subr.bf16.mxu0 %v961_v12  ;;  %404 = vmatprep.subr.bf16.mxu1 %v961_v12 }
  0x17   :  { %231 = vmatpush1.bf16.msra.mxu0 %v970_v13  ;;  %405 = vmatpush1.bf16.msra.mxu1 %v970_v13 }
  0x18   :  { %232 = vmatprep.subr.bf16.mxu0 %v977_v14  ;;  %406 = vmatprep.subr.bf16.mxu1 %v977_v14 }
  0x1b   :  { %233 = vmatpush1.bf16.msra.mxu0 %v984_v15  ;;  %407 = vmatpush1.bf16.msra.mxu1 %v984_v15 }
  0x1c   :  { %234 = vmatprep.subr.bf16.mxu0 %v991_v16  ;;  %408 = vmatprep.subr.bf16.mxu1 %v991_v16 }
  0x1f   :  { %235 = vmatpush1.bf16.msra.mxu0 %v998_v17  ;;  %409 = vmatpush1.bf16.msra.mxu1 %v998_v17 }
  0x20   :  { %236 = vmatprep.subr.bf16.mxu0 %v1005_v18  ;;  %410 = vmatprep.subr.bf16.mxu1 %v1005_v18 }
  0x23   :  { %237 = vmatpush1.bf16.msra.mxu0 %v1015_v20  ;;  %411 = vmatpush1.bf16.msra.mxu1 %v1015_v20 }
  0x24   :  { %735 = vmatprep.subr.msk.bf16.mxu0 %vm213_vm1, %v1019_v21  ;;  %756 = vmatprep.subr.msk.bf16.mxu1 %vm213_vm1, %v1019_v21 }
  0x27   :  { %239 = vmatpush1.bf16.msra.mxu0 %v1028_v23  ;;  %413 = vmatpush1.bf16.msra.mxu1 %v1028_v23 }
  0x28   :  { %568 = vmatprep.subr.bf16.mxu0 %v887_v0  ;;  %782 = vmatprep.subr.bf16.mxu1 %v887_v0 }
  0x2a   :  { %253 = vmatmul.mubr.bf16.vlgmr.msra.gmra.mrb[0].mxu0 %v832_v24  ;;  %427 = vmatmul.mubr.bf16.vlgmr.msra.gmra.mrb[0].mxu1 %v835_v25 }
  0x2b   :  { %569 = vmatpush1.bf16.msra.mxu0 %v892_v1  ;;  %792 = vmatpush1.bf16.msra.mxu1 %v892_v1 }
  0x2c   :  { %570 = vmatprep.subr.bf16.mxu0 %v899_v2  ;;  %737 = vmatprep.mubr.msk.bf16.mxu0 %vm200_vm0, %v838_v26 }
  0x2d   :  { %758 = vmatprep.mubr.msk.bf16.mxu1 %vm200_vm0, %v840_v27  ;;  %783 = vmatprep.subr.bf16.mxu1 %v899_v2 }
  0x2f   :  { %571 = vmatpush1.bf16.msra.mxu0 %v906_v3  ;;  %793 = vmatpush1.bf16.msra.mxu1 %v906_v3 }
  0x30   :  { %572 = vmatprep.subr.bf16.mxu0 %v913_v4  ;;  %784 = vmatprep.subr.bf16.mxu1 %v913_v4 }
  0x32   :  { %263 = vmatmul.mubr.bf16.gmra.mrb[4].mxu0 %v842_v28  ;;  %437 = vmatmul.mubr.bf16.gmra.mrb[4].mxu1 %v843_v29 }
  0x33   :  { %573 = vmatpush1.bf16.msra.mxu0 %v920_v5  ;;  %794 = vmatpush1.bf16.msra.mxu1 %v920_v5 }
  0x34   :  { %574 = vmatprep.subr.bf16.mxu0 %v927_v6  ;;  %738 = vmatprep.mubr.msk.bf16.mxu0 %vm200_vm0, %v844_v30 }
  0x35   :  { %759 = vmatprep.mubr.msk.bf16.mxu1 %vm200_vm0, %v846_v31  ;;  %785 = vmatprep.subr.bf16.mxu1 %v927_v6 }
  0x37   :  { %575 = vmatpush1.bf16.msra.mxu0 %v934_v7  ;;  %795 = vmatpush1.bf16.msra.mxu1 %v934_v7 }
  0x38   :  { %576 = vmatprep.subr.bf16.mxu0 %v941_v8  ;;  %786 = vmatprep.subr.bf16.mxu1 %v941_v8 }
  0x3a   :  { %273 = vmatmul.mubr.bf16.gmra.mrb[8].mxu0 %v848_v32  ;;  %447 = vmatmul.mubr.bf16.gmra.mrb[8].mxu1 %v849_v33 }
  0x3b   :  { %577 = vmatpush1.bf16.msra.mxu0 %v954_v11  ;;  %796 = vmatpush1.bf16.msra.mxu1 %v954_v11 }
  0x3c   :  { %578 = vmatprep.subr.bf16.mxu0 %v961_v12  ;;  %739 = vmatprep.mubr.msk.bf16.mxu0 %vm200_vm0, %v850_v34 }
  0x3d   :  { %760 = vmatprep.mubr.msk.bf16.mxu1 %vm200_vm0, %v852_v35  ;;  %787 = vmatprep.subr.bf16.mxu1 %v961_v12 }
  0x3f   :  { %579 = vmatpush1.bf16.msra.mxu0 %v970_v13  ;;  %797 = vmatpush1.bf16.msra.mxu1 %v970_v13 }
  0x40   :  { %580 = vmatprep.subr.bf16.mxu0 %v977_v14  ;;  %788 = vmatprep.subr.bf16.mxu1 %v977_v14 }
  0x42   :  { %283 = vmatmul.mubr.bf16.gmra.mrb[12].mxu0 %v854_v36  ;;  %457 = vmatmul.mubr.bf16.gmra.mrb[12].mxu1 %v855_v37 }
  0x43   :  { %581 = vmatpush1.bf16.msra.mxu0 %v984_v15  ;;  %798 = vmatpush1.bf16.msra.mxu1 %v984_v15 }
  0x44   :  { %582 = vmatprep.subr.bf16.mxu0 %v991_v16  ;;  %789 = vmatprep.subr.bf16.mxu1 %v991_v16 }
  0x45   :  { %778 = vmatprep.mubr.msk.bf16.mxu0 %vm200_vm0, %v858_v38  ;;  %780 = vmatprep.mubr.msk.bf16.mxu1 %vm200_vm0, %v861_v39 }
  0x47   :  { %583 = vmatpush1.bf16.msra.mxu0 %v998_v17  ;;  %799 = vmatpush1.bf16.msra.mxu1 %v998_v17 }
  0x48   :  { %584 = vmatprep.subr.bf16.mxu0 %v1005_v18  ;;  %790 = vmatprep.subr.bf16.mxu1 %v1005_v18 }
  0x4b   :  { %585 = vmatpush1.bf16.msra.mxu0 %v1015_v20  ;;  %800 = vmatpush1.bf16.msra.mxu1 %v1015_v20 }
  0x4c   :  { %777 = vmatprep.subr.msk.bf16.mxu0 %vm213_vm1, %v1019_v21  ;;  %791 = vmatprep.subr.msk.bf16.mxu1 %vm213_vm1, %v1019_v21 }
  0x4f   :  { %587 = vmatpush1.bf16.msra.mxu0 %v1028_v23  ;;  %801 = vmatpush1.bf16.msra.mxu1 %v1028_v23 }
  0x52   :  { %601 = vmatmul.mubr.bf16.vlgmr.msra.gmra.mrb[16].mxu0 %v856_v40  ;;  %621 = vmatmul.mubr.bf16.vlgmr.msra.gmra.mrb[16].mxu1 %v859_v41 }
  0x53   :  { %779 = vmatprep.mubr.msk.bf16.mxu0 %vm200_vm0, %v862_v42  ;;  %781 = vmatprep.mubr.msk.bf16.mxu1 %vm200_vm0, %v865_v43 }
  0x5a   :  { %611 = vmatmul.mubr.bf16.gmra.mrb[20].mxu0 %v864_v44  ;;  %631 = vmatmul.mubr.bf16.gmra.mrb[20].mxu1 %v867_v45 }
  0xfd   :  { %v254_v47 = vpop.f32.mrb[0].mxu0  ;;  %v428_v48 = vpop.f32.mrb[0].mxu1 }
  0xfe   :  { %v293_v49 = vmax.f32 %v254_v47, 0.0  ;;  %v256_v50 = vpop.f32.mrb[1].mxu0  ;;  %v467_v51 = vmax.f32 %v428_v48, 0.0  ;;  %v430_v52 = vpop.f32.mrb[1].mxu1 }
  0xff   :  { %v258_v53 = vpop.f32.mrb[2].mxu0  ;;  %v468_v54 = vmax.f32 %v430_v52, 0.0  ;;  %v432_v55 = vpop.f32.mrb[2].mxu1  ;;  %v294_v60 = vmax.f32 %v256_v50, 0.0 }
 0x100   :  { %v295_v56 = vmax.f32 %v258_v53, 0.0  ;;  %v260_v57 = vpop.f32.mrb[3].mxu0  ;;  %v469_v58 = vmax.f32 %v432_v55, 0.0  ;;  %v434_v59 = vpop.f32.mrb[3].mxu1 }
 0x101   :  { %v296_v61 = vmax.f32 %v260_v57, 0.0  ;;  %v470_v62 = vmax.f32 %v434_v59, 0.0 }
 0x102   :  { %v309_v63 = vadd.f32 %v295_v56, %v293_v49  ;;  %v483_v0 = vadd.f32 %v469_v58, %v467_v51 }
 0x103   :  { %v322_v1 = vadd.f32 %v296_v61, %v294_v60  ;;  %v496_v2 = vadd.f32 %v470_v62, %v468_v54 }
 0x105   :  { %v264_v3 = vpop.f32.mrb[4].mxu0  ;;  %v438_v4 = vpop.f32.mrb[4].mxu1 }
 0x106   :  { %v297_v5 = vmax.f32 %v264_v3, 0.0  ;;  %v266_v6 = vpop.f32.mrb[5].mxu0  ;;  %v471_v7 = vmax.f32 %v438_v4, 0.0  ;;  %v440_v8 = vpop.f32.mrb[5].mxu1 }
 0x107   :  { %v298_v9 = vmax.f32 %v266_v6, 0.0  ;;  %v268_v10 = vpop.f32.mrb[6].mxu0  ;;  %v472_v11 = vmax.f32 %v440_v8, 0.0  ;;  %v442_v12 = vpop.f32.mrb[6].mxu1 }
 0x108   :  { %v310_v13 = vadd.f32 %v309_v63, %v297_v5  ;;  %v299_v14 = vmax.f32 %v268_v10, 0.0  ;;  %v484_v15 = vadd.f32 %v483_v0, %v471_v7  ;;  %v270_v16 = vpop.f32.mrb[7].mxu0  ;;  %v473_v17 = vmax.f32 %v442_v12, 0.0  ;;  %v444_v18 = vpop.f32.mrb[7].mxu1 }
 0x109   :  { %v323_v19 = vadd.f32 %v322_v1, %v298_v9  ;;  %v300_v20 = vmax.f32 %v270_v16, 0.0  ;;  %v497_v21 = vadd.f32 %v496_v2, %v472_v11  ;;  %v474_v22 = vmax.f32 %v444_v18, 0.0 }
 0x10a   :  { %v311_v23 = vadd.f32 %v310_v13, %v299_v14  ;;  %v485_v24 = vadd.f32 %v484_v15, %v473_v17 }
 0x10b   :  { %v324_v25 = vadd.f32 %v323_v19, %v300_v20  ;;  %v498_v26 = vadd.f32 %v497_v21, %v474_v22 }
 0x10d   :  { %v274_v27 = vpop.f32.mrb[8].mxu0  ;;  %v448_v28 = vpop.f32.mrb[8].mxu1 }
 0x10e   :  { %v301_v29 = vmax.f32 %v274_v27, 0.0  ;;  %v475_v30 = vmax.f32 %v448_v28, 0.0  ;;  %v276_v31 = vpop.f32.mrb[9].mxu0  ;;  %v450_v32 = vpop.f32.mrb[9].mxu1 }
 0x10f   :  { %v302_v33 = vmax.f32 %v276_v31, 0.0  ;;  %v476_v34 = vmax.f32 %v450_v32, 0.0  ;;  %v278_v35 = vpop.f32.mrb[10].mxu0  ;;  %v452_v36 = vpop.f32.mrb[10].mxu1 }
 0x110   :  { %v312_v37 = vadd.f32 %v311_v23, %v301_v29  ;;  %v486_v38 = vadd.f32 %v485_v24, %v475_v30  ;;  %v303_v39 = vmax.f32 %v278_v35, 0.0  ;;  %v477_v40 = vmax.f32 %v452_v36, 0.0  ;;  %v280_v41 = vpop.f32.mrb[11].mxu0  ;;  %v454_v42 = vpop.f32.mrb[11].mxu1 }
 0x111   :  { %v325_v43 = vadd.f32 %v324_v25, %v302_v33  ;;  %v499_v44 = vadd.f32 %v498_v26, %v476_v34  ;;  %v304_v45 = vmax.f32 %v280_v41, 0.0  ;;  %v478_v46 = vmax.f32 %v454_v42, 0.0 }
 0x112   :  { %v313_v47 = vadd.f32 %v312_v37, %v303_v39  ;;  %v487_v48 = vadd.f32 %v486_v38, %v477_v40 }
 0x113   :  { %v326_v49 = vadd.f32 %v325_v43, %v304_v45  ;;  %v500_v50 = vadd.f32 %v499_v44, %v478_v46 }
 0x115   :  { %v284_v51 = vpop.f32.mrb[12].mxu0  ;;  %v458_v52 = vpop.f32.mrb[12].mxu1 }
 0x116   :  { %v305_v53 = vmax.f32 %v284_v51, 0.0  ;;  %v479_v54 = vmax.f32 %v458_v52, 0.0  ;;  %v286_v55 = vpop.f32.mrb[13].mxu0  ;;  %v460_v56 = vpop.f32.mrb[13].mxu1 }
 0x117   :  { %v306_v57 = vmax.f32 %v286_v55, 0.0  ;;  %v480_v58 = vmax.f32 %v460_v56, 0.0  ;;  %v288_v59 = vpop.f32.mrb[14].mxu0  ;;  %v462_v60 = vpop.f32.mrb[14].mxu1 }
 0x118   :  { %v314_v61 = vadd.f32 %v313_v47, %v305_v53  ;;  %v488_v62 = vadd.f32 %v487_v48, %v479_v54  ;;  %v307_v63 = vmax.f32 %v288_v59, 0.0  ;;  %v481_v0 = vmax.f32 %v462_v60, 0.0  ;;  %v290_v1 = vpop.f32.mrb[15].mxu0  ;;  %v464_v2 = vpop.f32.mrb[15].mxu1 }
 0x119   :  { %v327_v3 = vadd.f32 %v326_v49, %v306_v57  ;;  %v501_v4 = vadd.f32 %v500_v50, %v480_v58  ;;  %v308_v5 = vmax.f32 %v290_v1, 0.0  ;;  %v482_v6 = vmax.f32 %v464_v2, 0.0 }
 0x11a   :  { %v315_v7 = vadd.f32 %v314_v61, %v307_v63  ;;  %v489_v8 = vadd.f32 %v488_v62, %v481_v0 }
 0x11b   :  { %v328_v9 = vadd.f32 %v327_v3, %v308_v5  ;;  %v502_v10 = vadd.f32 %v501_v4, %v482_v6 }
 0x11c   :  { %v316_v11 = vrot.slane %v315_v7, 4  ;;  %v490_v12 = vrot.slane %v489_v8, 4 }
 0x11d   :  { %v329_v13 = vrot.slane %v328_v9, 4  ;;  %v503_v14 = vrot.slane %v502_v10, 4 }
 0x11e   :  { %v317_v15 = vadd.f32 %v316_v11, %v315_v7  ;;  %v491_v16 = vadd.f32 %v490_v12, %v489_v8 }
 0x11f   :  { %v330_v17 = vadd.f32 %v329_v13, %v328_v9  ;;  %v504_v18 = vadd.f32 %v503_v14, %v502_v10 }
 0x120   :  { %v318_v19 = vrot.slane %v317_v15, 2  ;;  %v492_v20 = vrot.slane %v491_v16, 2 }
 0x121   :  { %v331_v21 = vrot.slane %v330_v17, 2  ;;  %v505_v22 = vrot.slane %v504_v18, 2 }
 0x122   :  { %v319_v23 = vadd.f32 %v318_v19, %v317_v15  ;;  %v493_v24 = vadd.f32 %v492_v20, %v491_v16 }
 0x123   :  { %v332_v25 = vadd.f32 %v331_v21, %v330_v17  ;;  %v506_v26 = vadd.f32 %v505_v22, %v504_v18 }
 0x124   :  { %v320_v27 = vrot.slane %v319_v23, 1  ;;  %v494_v28 = vrot.slane %v493_v24, 1 }
 0x125   :  { %v333_v29 = vrot.slane %v332_v25, 1  ;;  %v507_v30 = vrot.slane %v506_v26, 1  ;;  %v602_v31 = vpop.f32.mrb[16].mxu0  ;;  %v622_v32 = vpop.f32.mrb[16].mxu1 }
 0x126   :  { %v321_v33 = vadd.f32 %v320_v27, %v319_v23  ;;  %v495_v34 = vadd.f32 %v494_v28, %v493_v24  ;;  %v604_v35 = vpop.f32.mrb[17].mxu0  ;;  %v624_v36 = vpop.f32.mrb[17].mxu1  ;;  %v641_v42 = vmax.f32 %v602_v31, 0.0  ;;  %v649_v1 = vmax.f32 %v622_v32, 0.0  ;;  %v685_v32 = vld [vmem:[%s1165_s2] sm:$0x77] }
 0x127   :  { %v334_v37 = vadd.f32 %v333_v29, %v332_v25  ;;  %v508_v38 = vadd.f32 %v507_v30, %v506_v26  ;;  %v606_v39 = vpop.f32.mrb[18].mxu0  ;;  %v626_v40 = vpop.f32.mrb[18].mxu1  ;;  %v642_v47 = vmax.f32 %v604_v35, 0.0  ;;  %v650_v3 = vmax.f32 %v624_v36, 0.0 }
 0x128   :  { %v687_v41 = vsel %vm686_vm2, %v321_v33, %v495_v34  ;;  %v643_v43 = vmax.f32 %v606_v39, 0.0  ;;  %v608_v44 = vpop.f32.mrb[19].mxu0  ;;  %v628_v45 = vpop.f32.mrb[19].mxu1  ;;  %v651_v5 = vmax.f32 %v626_v40, 0.0 }
 0x129   :  { %v688_v46 = vsel %vm686_vm2, %v334_v37, %v508_v38  ;;  %v644_v48 = vmax.f32 %v608_v44, 0.0  ;;  %v652_v8 = vmax.f32 %v628_v45, 0.0 }
 0x12a   :  { %v657_v49 = vadd.f32 %v643_v43, %v641_v42 }
 0x12b   :  { %v670_v50 = vadd.f32 %v644_v48, %v642_v47 }
 0x12d   :  { %v612_v51 = vpop.f32.mrb[20].mxu0  ;;  %v632_v52 = vpop.f32.mrb[20].mxu1 }
 0x12e   :  { %v645_v53 = vmax.f32 %v612_v51, 0.0  ;;  %v614_v54 = vpop.f32.mrb[21].mxu0  ;;  %v634_v55 = vpop.f32.mrb[21].mxu1  ;;  %v653_v7 = vmax.f32 %v632_v52, 0.0 }
 0x12f   :  { %v646_v56 = vmax.f32 %v614_v54, 0.0  ;;  %v616_v57 = vpop.f32.mrb[22].mxu0  ;;  %v636_v58 = vpop.f32.mrb[22].mxu1  ;;  %v654_v10 = vmax.f32 %v634_v55, 0.0 }
 0x130   :  { %v658_v59 = vadd.f32 %v657_v49, %v645_v53  ;;  %v647_v60 = vmax.f32 %v616_v57, 0.0  ;;  %v618_v61 = vpop.f32.mrb[23].mxu0  ;;  %v638_v62 = vpop.f32.mrb[23].mxu1  ;;  %v655_v14 = vmax.f32 %v636_v58, 0.0 }
 0x131   :  { %v671_v63 = vadd.f32 %v670_v50, %v646_v56  ;;  %v648_v0 = vmax.f32 %v618_v61, 0.0  ;;  %v656_v16 = vmax.f32 %v638_v62, 0.0 }
 0x132   :  { %v659_v2 = vadd.f32 %v658_v59, %v647_v60 }
 0x133   :  { %v672_v4 = vadd.f32 %v671_v63, %v648_v0 }
 0x134   :  { %v660_v6 = vadd.f32 %v659_v2, %v649_v1 }
 0x135   :  { %v673_v9 = vadd.f32 %v672_v4, %v650_v3 }
 0x136   :  { %v661_v11 = vadd.f32 %v660_v6, %v651_v5 }
 0x137   :  { %v674_v12 = vadd.f32 %v673_v9, %v652_v8 }
 0x138   :  { %v662_v13 = vadd.f32 %v661_v11, %v653_v7 }
 0x139   :  { %v675_v15 = vadd.f32 %v674_v12, %v654_v10 }
 0x13a   :  { %v663_v17 = vadd.f32 %v662_v13, %v655_v14 }
 0x13b   :  { %v676_v18 = vadd.f32 %v675_v15, %v656_v16 }
 0x13c   :  { %v664_v19 = vrot.slane %v663_v17, 4 }
 0x13d   :  { %v677_v20 = vrot.slane %v676_v18, 4 }
 0x13e   :  { %v665_v21 = vadd.f32 %v664_v19, %v663_v17 }
 0x13f   :  { %v678_v22 = vadd.f32 %v677_v20, %v676_v18 }
 0x140   :  { %v666_v23 = vrot.slane %v665_v21, 2 }
 0x141   :  { %v679_v24 = vrot.slane %v678_v22, 2 }
 0x142   :  { %v667_v25 = vadd.f32 %v666_v23, %v665_v21 }
 0x143   :  { %v680_v26 = vadd.f32 %v679_v24, %v678_v22 }
 0x144   :  { %v668_v27 = vrot.slane %v667_v25, 1 }
 0x145   :  { %v681_v28 = vrot.slane %v680_v26, 1 }
 0x146   :  { %v669_v29 = vadd.f32 %v668_v27, %v667_v25 }
 0x147   :  { %v682_v30 = vadd.f32 %v681_v28, %v680_v26 }
 0x148   :  { %v689_v31 = vsel %vm213_vm1, %v687_v41, %v669_v29 }
 0x149   :  { %v690_v33 = vsel %vm213_vm1, %v688_v46, %v682_v30 }
 0x14a   :  { %v693_v34 = vcombine.low %v689_v31, %v690_v33 }
 0x14c   :  { %v695_v35 = vadd.f32 %v693_v34, %v685_v32 }
 0x14e   :  { %696 = vst [vmem:[%s1165_s2] sm:$0x77] %v695_v35 }

</bundles_post_ra>
